<compile_context>
chip_gen: v7x
topology: tpu7x:2x2x1
jax: 0.10.0
libtpu: 0.0.40
codegen_flags: <defaults>
</compile_context>

<pallas_src>
import functools

import jax
import jax.numpy as jnp
import numpy as np
from jax import lax
from jax.experimental import pallas as pl
from jax.experimental.pallas import tpu as pltpu


def _round_up(v, m):
    return ((v + m - 1) // m) * m


def _vmem_capacity_bytes():
    """Generation-aware VMEM capacity; falls back to the smallest (v7x, 64 MiB)."""
    try:
        info = pltpu.get_tpu_info()
        for name in ("vmem_capacity_bytes", "vmem_size_bytes", "vmem_bytes"):
            cap = getattr(info, name, None)
            if cap:
                return int(cap)
    except Exception:
        pass
    return 64 << 20


def _pick_tk(d_per_core, m, hid, budget_bytes):
    """Largest 128-multiple K chunk whose total resident VMEM footprint
    (double-buffered bf16 x and w1 blocks + resident f32 partial-output blocks
    + slack for compiler scratch) stays inside budget_bytes."""
    per_col = 2 * (m * 2 + hid * 2)                     # 2x-buffered bf16 x + w1
    fixed = 2 * (m * hid * 4) + 2 * (8 * 128 * 4) + (1 << 20)
    avail = max(budget_bytes - fixed, per_col * 128)
    tk = max(128, (avail // per_col) // 128 * 128)
    return int(min(tk, _round_up(d_per_core, 128)))


# -----------------------------------------------------------------------------
# Kernel 1: K-streamed partial x@w1 + warp-consistency partial L1 (per core)
# -----------------------------------------------------------------------------
def _stream_kernel(x_ref, w1_ref, ph_ref, pw_ref, *, B, n_pairs, P8):
    k = pl.program_id(1)

    @pl.when(k == 0)
    def _init():
        ph_ref[...] = jnp.zeros_like(ph_ref)
        pw_ref[...] = jnp.zeros_like(pw_ref)

    xb = x_ref[...]                                         # (M, TK) bf16

    # model hot path: K-chunked first matmul, f32 accumulation in the
    # core-resident output block (bf16 MXU inputs).
    ph_ref[...] += jnp.dot(xb, w1_ref[...],
                           preferred_element_type=jnp.float32)

    # warp-consistency partial sums: |sample_p - sample_0| on the already
    # resident chunk.  One full reduce per pair (static slices, no concat
    # copy); scalars accumulate into a lane-dense (P8, 128) resident tile.
    xf = xb.astype(jnp.float32)
    x0 = xf[:B, :]
    row = lax.broadcasted_iota(jnp.int32, (P8, 128), 0)
    upd = jnp.zeros((P8, 128), jnp.float32)
    for p in range(n_pairs):
        s_p = jnp.sum(jnp.abs(xf[(p + 1) * B:(p + 2) * B, :] - x0))
        upd = upd + jnp.where(row == p, s_p, 0.0)
    pw_ref[...] += upd


def run_stream(x_pad, w1_pad, *, NC, nk, M, TK, HID, B, n_pairs, P8, vmem_limit):
    kernel = functools.partial(_stream_kernel, B=B, n_pairs=n_pairs, P8=P8)
    return pl.pallas_call(
        kernel,
        out_shape=(
            jax.ShapeDtypeStruct((NC, M, HID), jnp.float32),   # partial x @ w1
            jax.ShapeDtypeStruct((NC, P8, 128), jnp.float32),  # partial pair L1
        ),
        grid_spec=pltpu.PrefetchScalarGridSpec(
            num_scalar_prefetch=0,
            grid=(NC, nk),
            in_specs=[
                pl.BlockSpec((M, TK), lambda c, k: (0, c * nk + k)),     # x
                pl.BlockSpec((TK, HID), lambda c, k: (c * nk + k, 0)),   # w1
            ],
            out_specs=(
                pl.BlockSpec((None, M, HID), lambda c, k: (c, 0, 0)),
                pl.BlockSpec((None, P8, 128), lambda c, k: (c, 0, 0)),
            ),
        ),
        compiler_params=pltpu.CompilerParams(
            dimension_semantics=("parallel", "arbitrary"),
            vmem_limit_bytes=vmem_limit,
        ),
    )(x_pad, w1_pad)


# -----------------------------------------------------------------------------
# Kernel 2: micro-epilogue — combine partials, ReLU + matmul 2, loss aggregation
# -----------------------------------------------------------------------------
def _finalize_kernel(lam_ref, ph_ref, pw_ref, w2_ref,
                     feat_ref, scal_ref, pair_ref,
                     *, NC, M, B, D, F, HID, n_pairs):
    hacc = ph_ref[0]
    wacc = pw_ref[0]
    for c in range(1, NC):
        hacc = hacc + ph_ref[c]
        wacc = wacc + pw_ref[c]

    h = jnp.maximum(hacc, 0.0)                              # (M, HID) f32
    y = jnp.dot(h.astype(jnp.bfloat16), w2_ref[...],
                preferred_element_type=jnp.float32)         # (M, F_pad) f32
    feat_ref[...] = y                                       # lane-dense store

    # Precomputed reciprocals (no divides on the VPU critical path).
    inv_mesh = 1.0 / float(M * F)      # padded y columns are exactly 0
    inv_mano = 1.0 / float(M * HID)
    inv_bd = 1.0 / float(B * D)        # padded x columns give |diff| == 0

    reg = jnp.sum(jnp.abs(y)) * inv_mesh                    # cat(mesh).mean()
    mano = jnp.sum(h * h) * inv_mano                        # stack(mano).mean()
    # pair p's |diff| total is replicated across the 128 lanes of row p;
    # rows >= n_pairs are zero -> divide by the lane replication factor.
    warp = jnp.sum(wacc) * (inv_bd / float(n_pairs * 128))

    lam_d = lam_ref[0]
    lam_c = lam_ref[1]
    lam_w = lam_ref[2]
    loss = lam_d * reg + lam_c * mano + lam_w * warp

    # Pack all scalar losses into one lane-dense (1, 128) tile.
    col = lax.broadcasted_iota(jnp.int32, (1, 128), 1)
    scal_ref[...] = (jnp.where(col == 0, loss, 0.0)
                     + jnp.where(col == 1, reg, 0.0)
                     + jnp.where(col == 2, mano, 0.0)
                     + jnp.where(col == 3, warp, 0.0))

    # Per-pair means, broadcast along lanes (wrapper takes column 0).
    pair_ref[...] = wacc[:n_pairs, :] * inv_bd


def run_finalize(lam, ph, pw, w2_pad, *, NC, M, B, D, F, F_pad, HID,
                 n_pairs, P8):
    kernel = functools.partial(_finalize_kernel, NC=NC, M=M, B=B, D=D, F=F,
                               HID=HID, n_pairs=n_pairs)
    return pl.pallas_call(
        kernel,
        out_shape=(
            jax.ShapeDtypeStruct((M, F_pad), jnp.float32),        # features
            jax.ShapeDtypeStruct((1, 128), jnp.float32),          # scalars
            jax.ShapeDtypeStruct((n_pairs, 128), jnp.float32),    # pair L1s
        ),
        grid_spec=pltpu.PrefetchScalarGridSpec(
            num_scalar_prefetch=1,                  # lam -> SMEM
            grid=(1,),
            in_specs=[
                pl.BlockSpec((NC, M, HID), lambda i, lam: (0, 0, 0)),
                pl.BlockSpec((NC, P8, 128), lambda i, lam: (0, 0, 0)),
                pl.BlockSpec((HID, F_pad), lambda i, lam: (0, 0)),
            ],
            out_specs=(
                pl.BlockSpec((M, F_pad), lambda i, lam: (0, 0)),
                pl.BlockSpec((1, 128), lambda i, lam: (0, 0)),
                pl.BlockSpec((n_pairs, 128), lambda i, lam: (0, 0)),
            ),
        ),
        compiler_params=pltpu.CompilerParams(
            dimension_semantics=("arbitrary",),
        ),
    )(lam, ph, pw, w2_pad)


# -----------------------------------------------------------------------------
# WarpRegNet.forward wrapper
# -----------------------------------------------------------------------------
def warpreg_forward(x, w1, w2, *, supervision=("data", "consist"),
                    step_count=0, lambda_data=1.0, lambda_consist=1.0,
                    progressive_consist=True, progressive_steps=1000):
    S, B, C, H, W = x.shape
    assert S >= 2, "need at least two samples for the consistency branch"
    M = S * B
    D = C * H * W
    HID = w1.shape[1]
    F = w2.shape[1]
    F_pad = _round_up(F, 128)
    n_pairs = S - 1
    P8 = _round_up(n_pairs, 8)

    # --- generation-aware tiling / VMEM budget --------------------------------
    NC = 2                                   # split K stream across 2 TCs (v7x);
                                             # harmless (serialized) on 1-TC chips
    vmem_cap = _vmem_capacity_bytes()
    vmem_limit = int(vmem_cap * 3 // 4)      # ~48 MiB on v7x, ~96 MiB on v5e/v6e
    TK = _pick_tk(int(pl.cdiv(D, NC)), M, HID, budget_bytes=vmem_limit // 3)
    nk = int(pl.cdiv(int(pl.cdiv(D, NC)), TK))
    D_pad = NC * nk * TK                     # zero-padded K: no effect on results

    # --- bf16 streaming inputs (halve x HBM traffic), zero-padded -------------
    x2 = x.reshape(M, D).astype(jnp.bfloat16)            # torch .view flatten
    x_pad = jnp.zeros((M, D_pad), jnp.bfloat16).at[:, :D].set(x2)
    w1_pad = jnp.zeros((D_pad, HID), jnp.float32).at[:D, :].set(w1)
    w1_pad = w1_pad.astype(jnp.bfloat16)
    w2_pad = jnp.zeros((HID, F_pad), jnp.float32).at[:, :F].set(w2)
    w2_pad = w2_pad.astype(jnp.bfloat16)                  # padded cols stay 0

    has_data = "data" in supervision
    has_consist = "consist" in supervision

    # progressive lambda schedule (python scalars, matches torch code)
    if progressive_consist:
        lc = min(lambda_consist * step_count / progressive_steps, lambda_consist)
        ld = lambda_data - lc
    else:
        ld, lc = lambda_data, lambda_consist
    lam = jnp.array(
        [ld * float(has_data), ld * float(has_consist), lc * float(has_consist)],
        dtype=jnp.float32,
    )

    ph, pw = run_stream(x_pad, w1_pad, NC=NC, nk=nk, M=M, TK=TK, HID=HID, B=B,
                        n_pairs=n_pairs, P8=P8, vmem_limit=vmem_limit)
    feats_pad, scalars, pair_tile = run_finalize(
        lam, ph, pw, w2_pad, NC=NC, M=M, B=B, D=D, F=F, F_pad=F_pad, HID=HID,
        n_pairs=n_pairs, P8=P8)

    feats = feats_pad.reshape(S, B, F_pad)[:, :, :F]
    loss = scalars[0, 0]
    reg = scalars[0, 1]
    mano = scalars[0, 2]
    warp = scalars[0, 3]

    aggregate_losses = {"mano_reg_loss": mano}
    if has_data:
        aggregate_losses["reg_loss"] = reg
    if has_consist:
        aggregate_losses["warp_consist"] = warp
        pair_results = pair_tile[:, 0]
    else:
        pair_results = None
    return loss, aggregate_losses, feats, pair_results, lam


# -----------------------------------------------------------------------------
# pure-JAX reference (same bf16 x stream / bf16 matmul inputs / f32 accumulation)
# -----------------------------------------------------------------------------
def reference_forward(x, w1, w2, lam):
    S, B, C, H, W = x.shape
    D = C * H * W
    F = w2.shape[1]
    xb = x.reshape(S, B, D).astype(jnp.bfloat16)             # matches kernel's stream
    x2 = xb.reshape(S * B, D)
    h = jnp.maximum(
        jnp.dot(x2, w1.astype(jnp.bfloat16),
                preferred_element_type=jnp.float32), 0.0)
    y = jnp.dot(h.astype(jnp.bfloat16), w2.astype(jnp.bfloat16),
                preferred_element_type=jnp.float32)
    reg = jnp.mean(jnp.abs(y))                                # cat(mesh).mean()
    mano = jnp.mean(h * h)                                    # stack(mano).mean()
    xf = xb.astype(jnp.float32)
    pair = jnp.mean(jnp.abs(xf[1:] - xf[:1]), axis=(1, 2))    # per-pair L1
    warp = jnp.mean(pair)
    loss = lam[0] * reg + lam[1] * mano + lam[2] * warp
    return loss, reg, mano, warp, pair, y.reshape(S, B, F)


if __name__ == "__main__":
    S, B, C, H, W = 3, 2, 4, 16, 16          # 3 frames, batch 2, NCHW images
    D, HID, F = C * H * W, 128, 8

    key = jax.random.PRNGKey(0)
    kx, k1, k2 = jax.random.split(key, 3)
    x = jax.random.normal(kx, (S, B, C, H, W), dtype=jnp.float32)
    w1 = 0.02 * jax.random.normal(k1, (D, HID), dtype=jnp.float32)
    w2 = 0.02 * jax.random.normal(k2, (HID, F), dtype=jnp.float32)

    loss, agg, feats, pairs, lam = warpreg_forward(
        x, w1, w2, supervision=("data", "consist"), step_count=500
    )
    jax.block_until_ready(loss)
    jax.block_until_ready(feats)

    rl, rr, rm, rw, rp, rf = reference_forward(x, w1, w2, lam)
    np.testing.assert_allclose(np.asarray(loss), np.asarray(rl), rtol=1e-2, atol=1e-4)
    np.testing.assert_allclose(np.asarray(agg["reg_loss"]), np.asarray(rr), rtol=1e-2, atol=1e-4)
    np.testing.assert_allclose(np.asarray(agg["mano_reg_loss"]), np.asarray(rm), rtol=1e-2, atol=1e-4)
    np.testing.assert_allclose(np.asarray(agg["warp_consist"]), np.asarray(rw), rtol=1e-2, atol=1e-4)
    np.testing.assert_allclose(np.asarray(pairs), np.asarray(rp), rtol=1e-2, atol=1e-4)
    np.testing.assert_allclose(np.asarray(feats), np.asarray(rf), rtol=1e-2, atol=1e-4)
    print("KERNEL_OK")
</pallas_src>

<mosaic_0001>
module attributes {stable_mosaic.version = 11 : i64} {
  func.func @_stream_kernel(%arg0: i32, %arg1: i32, %arg2: memref<6x512xbf16, #tpu.memory_space<vmem>>, %arg3: memref<512x128xbf16, #tpu.memory_space<vmem>>, %arg4: memref<1x6x128xf32, #tpu.memory_space<vmem>>, %arg5: memref<1x8x128xf32, #tpu.memory_space<vmem>>) attributes {dimension_semantics = [#tpu.dimension_semantics<parallel>, #tpu.dimension_semantics<arbitrary>], iteration_bounds = array<i64: 2, 1>, scalar_prefetch = 0 : i64, scratch_operands = 0 : i64, tpu.core_type = #tpu.core_type<tc>, window_params = [{transform_indices = @transform_0, window_bounds = array<i64: 6, 512>}, {transform_indices = @transform_1, window_bounds = array<i64: 512, 128>}, {transform_indices = @transform_2, window_bounds = array<i64: 1, 6, 128>}, {transform_indices = @transform_3, window_bounds = array<i64: 1, 8, 128>}]} {
    %c0_i32 = arith.constant 0 : i32
    %0 = arith.cmpi eq, %arg1, %c0_i32 : i32
    %1 = arith.extui %0 : i1 to i32
    %c0_i32_0 = arith.constant 0 : i32
    %2 = arith.cmpi ne, %1, %c0_i32_0 : i32
    scf.if %2 {
      %cst_22 = arith.constant 0.000000e+00 : f32
      %48 = vector.broadcast %cst_22 : f32 to vector<6x128xf32>
      %c0_23 = arith.constant 0 : index
      %c0_24 = arith.constant 0 : index
      %c0_25 = arith.constant 0 : index
      %49 = vector.load %arg4[%c0_23, %c0_24, %c0_25] : memref<1x6x128xf32, #tpu.memory_space<vmem>>, vector<1x6x128xf32>
      %50 = vector.shape_cast %49 : vector<1x6x128xf32> to vector<6x128xf32>
      %51 = vector.shape_cast %48 : vector<6x128xf32> to vector<1x6x128xf32>
      tpu.vector_store %arg4[%c0_23, %c0_24, %c0_25], %51 {strides = array<i32>} : memref<1x6x128xf32, #tpu.memory_space<vmem>>, vector<1x6x128xf32>,
      %cst_26 = arith.constant 0.000000e+00 : f32
      %52 = vector.broadcast %cst_26 : f32 to vector<8x128xf32>
      %c0_27 = arith.constant 0 : index
      %c0_28 = arith.constant 0 : index
      %c0_29 = arith.constant 0 : index
      %53 = vector.load %arg5[%c0_27, %c0_28, %c0_29] : memref<1x8x128xf32, #tpu.memory_space<vmem>>, vector<1x8x128xf32>
      %54 = vector.shape_cast %53 : vector<1x8x128xf32> to vector<8x128xf32>
      %55 = vector.shape_cast %52 : vector<8x128xf32> to vector<1x8x128xf32>
      tpu.vector_store %arg5[%c0_27, %c0_28, %c0_29], %55 {strides = array<i32>} : memref<1x8x128xf32, #tpu.memory_space<vmem>>, vector<1x8x128xf32>,
    } else {
    }
    %c0 = arith.constant 0 : index
    %c0_1 = arith.constant 0 : index
    %3 = vector.load %arg2[%c0, %c0_1] : memref<6x512xbf16, #tpu.memory_space<vmem>>, vector<6x512xbf16>
    %c0_2 = arith.constant 0 : index
    %c0_3 = arith.constant 0 : index
    %c0_4 = arith.constant 0 : index
    %4 = vector.load %arg4[%c0_2, %c0_3, %c0_4] : memref<1x6x128xf32, #tpu.memory_space<vmem>>, vector<1x6x128xf32>
    %5 = vector.shape_cast %4 : vector<1x6x128xf32> to vector<6x128xf32>
    %c0_5 = arith.constant 0 : index
    %c0_6 = arith.constant 0 : index
    %6 = vector.load %arg3[%c0_5, %c0_6] : memref<512x128xbf16, #tpu.memory_space<vmem>>, vector<512x128xbf16>
    %cst = arith.constant dense<0.000000e+00> : vector<6x128xf32>
    %7 = tpu.matmul %3, %6, %cst {dimension_numbers = #tpu.dot_dimension_numbers<[1], [0], [0], [1], [0, 0, 1, 1], [], []>} : vector<6x512xbf16>, vector<512x128xbf16>, vector<6x128xf32> -> vector<6x128xf32>
    %8 = arith.addf %5, %7 : vector<6x128xf32>
    %c0_7 = arith.constant 0 : index
    %c0_8 = arith.constant 0 : index
    %c0_9 = arith.constant 0 : index
    %9 = vector.load %arg4[%c0_7, %c0_8, %c0_9] : memref<1x6x128xf32, #tpu.memory_space<vmem>>, vector<1x6x128xf32>
    %10 = vector.shape_cast %9 : vector<1x6x128xf32> to vector<6x128xf32>
    %11 = vector.shape_cast %8 : vector<6x128xf32> to vector<1x6x128xf32>
    tpu.vector_store %arg4[%c0_7, %c0_8, %c0_9], %11 {strides = array<i32>} : memref<1x6x128xf32, #tpu.memory_space<vmem>>, vector<1x6x128xf32>,
    %12 = arith.extf %3 : vector<6x512xbf16> to vector<6x512xf32>
    %13 = vector.extract_strided_slice %12 {offsets = [0, 0], sizes = [2, 512], strides = [1, 1]} : vector<6x512xf32> to vector<2x512xf32>
    %14 = tpu.iota {dimensions = array<i32: 0>} : vector<8x128xi32>
    %cst_10 = arith.constant 0.000000e+00 : f32
    %15 = vector.broadcast %cst_10 : f32 to vector<8x128xf32>
    %16 = vector.extract_strided_slice %12 {offsets = [2, 0], sizes = [2, 512], strides = [1, 1]} : vector<6x512xf32> to vector<2x512xf32>
    %17 = arith.subf %16, %13 : vector<2x512xf32>
    %18 = math.absf %17 : vector<2x512xf32>
    %19 = vector.shape_cast %18 : vector<2x512xf32> to vector<1x2x512xf32>
    %cst_11 = arith.constant dense<0.000000e+00> : vector<1xf32>
    %20 = vector.multi_reduction <add>, %19, %cst_11 [1, 2] : vector<1x2x512xf32> to vector<1xf32>
    %21 = vector.shape_cast %20 : vector<1xf32> to vector<1x1x1xf32>
    %22 = vector.extract %21[0, 0, 0] : f32 from vector<1x1x1xf32>
    %c0_i32_12 = arith.constant 0 : i32
    %23 = vector.broadcast %c0_i32_12 : i32 to vector<8x128xi32>
    %24 = arith.cmpi eq, %14, %23 : vector<8x128xi32>
    %cst_13 = arith.constant 0.000000e+00 : f32
    %25 = vector.broadcast %22 : f32 to vector<8x128xf32>
    %26 = vector.broadcast %cst_13 : f32 to vector<8x128xf32>
    %27 = arith.select %24, %25, %26 : vector<8x128xi1>, vector<8x128xf32>
    %28 = arith.addf %15, %27 : vector<8x128xf32>
    %29 = vector.extract_strided_slice %12 {offsets = [4, 0], sizes = [2, 512], strides = [1, 1]} : vector<6x512xf32> to vector<2x512xf32>
    %30 = arith.subf %29, %13 : vector<2x512xf32>
    %31 = math.absf %30 : vector<2x512xf32>
    %32 = vector.shape_cast %31 : vector<2x512xf32> to vector<1x2x512xf32>
    %cst_14 = arith.constant dense<0.000000e+00> : vector<1xf32>
    %33 = vector.multi_reduction <add>, %32, %cst_14 [1, 2] : vector<1x2x512xf32> to vector<1xf32>
    %34 = vector.shape_cast %33 : vector<1xf32> to vector<1x1x1xf32>
    %35 = vector.extract %34[0, 0, 0] : f32 from vector<1x1x1xf32>
    %c1_i32 = arith.constant 1 : i32
    %36 = vector.broadcast %c1_i32 : i32 to vector<8x128xi32>
    %37 = arith.cmpi eq, %14, %36 : vector<8x128xi32>
    %cst_15 = arith.constant 0.000000e+00 : f32
    %38 = vector.broadcast %35 : f32 to vector<8x128xf32>
    %39 = vector.broadcast %cst_15 : f32 to vector<8x128xf32>
    %40 = arith.select %37, %38, %39 : vector<8x128xi1>, vector<8x128xf32>
    %41 = arith.addf %28, %40 : vector<8x128xf32>
    %c0_16 = arith.constant 0 : index
    %c0_17 = arith.constant 0 : index
    %c0_18 = arith.constant 0 : index
    %42 = vector.load %arg5[%c0_16, %c0_17, %c0_18] : memref<1x8x128xf32, #tpu.memory_space<vmem>>, vector<1x8x128xf32>
    %43 = vector.shape_cast %42 : vector<1x8x128xf32> to vector<8x128xf32>
    %44 = arith.addf %43, %41 : vector<8x128xf32>
    %c0_19 = arith.constant 0 : index
    %c0_20 = arith.constant 0 : index
    %c0_21 = arith.constant 0 : index
    %45 = vector.load %arg5[%c0_19, %c0_20, %c0_21] : memref<1x8x128xf32, #tpu.memory_space<vmem>>, vector<1x8x128xf32>
    %46 = vector.shape_cast %45 : vector<1x8x128xf32> to vector<8x128xf32>
    %47 = vector.shape_cast %44 : vector<8x128xf32> to vector<1x8x128xf32>
    tpu.vector_store %arg5[%c0_19, %c0_20, %c0_21], %47 {strides = array<i32>} : memref<1x8x128xf32, #tpu.memory_space<vmem>>, vector<1x8x128xf32>,
    return
  }
  func.func @transform_0(%arg0: i32, %arg1: i32) -> (i32, i32) {
    %c1_i32 = arith.constant 1 : i32
    %0 = arith.muli %arg0, %c1_i32 : i32
    %1 = arith.addi %0, %arg1 : i32
    %c0_i32 = arith.constant 0 : i32
    %c0_i32_0 = arith.constant 0 : i32
    return %c0_i32, %1 : i32, i32
  }
  func.func @transform_1(%arg0: i32, %arg1: i32) -> (i32, i32) {
    %c1_i32 = arith.constant 1 : i32
    %0 = arith.muli %arg0, %c1_i32 : i32
    %1 = arith.addi %0, %arg1 : i32
    %c0_i32 = arith.constant 0 : i32
    %c0_i32_0 = arith.constant 0 : i32
    return %1, %c0_i32 : i32, i32
  }
  func.func @transform_2(%arg0: i32, %arg1: i32) -> (i32, i32, i32) {
    %c0_i32 = arith.constant 0 : i32
    %c0_i32_0 = arith.constant 0 : i32
    %c0_i32_1 = arith.constant 0 : i32
    return %arg0, %c0_i32, %c0_i32_0 : i32, i32, i32
  }
  func.func @transform_3(%arg0: i32, %arg1: i32) -> (i32, i32, i32) {
    %c0_i32 = arith.constant 0 : i32
    %c0_i32_0 = arith.constant 0 : i32
    %c0_i32_1 = arith.constant 0 : i32
    return %arg0, %c0_i32, %c0_i32_0 : i32, i32, i32
  }
}

</mosaic_0001>

<bundles_post_ra>
// kernel: tpu_custom_call.1
= control target key start
LH: loop header
LB: loop body
LE: loop exit
PB: predicated region body
PF: predicated region fallthrough
CT: control target
= control target key end

     0   :  { %9 = vsyncpa [#allocation3], 0  ;;  %s1545_s0 = inlined_call_operand.hbm [shape: bf16[6,1024], index: 0, kind: input, shape index: {}]   ;;  %s1546_s1 = inlined_call_operand.hbm [shape: bf16[1024,128], index: 1, kind: input, shape index: {}]   ;;  %s1547_s2 = inlined_call_operand.vmem [shape: f32[2,6,128], index: 2, kind: output, shape index: {0}]   ;;  %s1548_s3 = inlined_call_operand.hbm [shape: f32[2,8,128], index: 3, kind: output, shape index: {1}]  }
   0x1   :  { %11 = vsyncpa [#allocation3 + $0x1], 0 }
   0x2   :  { %12 = vsyncpa [#allocation6], 0 }
   0x3   :  { %14 = vsyncpa [#allocation6 + $0x1], 0 }
   0x4   :  { %15 = vsyncpa [#allocation4], 0 }
   0x5   :  { %17 = vsyncpa [#allocation4 + $0x1], 0  ;;  %s1265_s12 = smov 0   ;;  %s1267_s13 = smov 0  }
   0x6   :  { %s1269_s14 = smov 0   ;;  %s1271_s15 = smov 0  }
   0x7   :  { %s1273_s16 = smov 0   ;;  %s1275_s17 = smov 0  }
   0x8 LB: > { %s880_s18 = sadd.s32 4294967295, %s1237_s17   ;;  %s881_s19 = sadd.s32 4294967294, %s1237_s17   ;;  %s1237_s17 = sphi %s1275_s17, %s23_s17   ;;  %s1233_s16 = sphi %s1273_s16, %s1567_s16   ;;  %s1229_s15 = sphi %s1271_s15, %s1566_s15   ;;  %s1225_s14 = sphi %s1269_s14, %s1565_s14   ;;  %s1221_s13 = sphi %s1267_s13, %s1564_s13   ;;  %s1217_s12 = sphi %s1265_s12, %s1563_s12  }
   0x9   : > { %s35_s20 = sadd.s32 1, %s1233_s16  ;;  %s44_s21 = sadd.s32 1, %s1225_s14 }
   0xa   : > { %p37_p0 = scmp.ge.s32.totalorder %s35_s20, 2  ;;  %p51_p1 = scmp.ne.s32.totalorder %s1225_s14, %s1221_s13 }
   0xb   : > { %p52_p2 = scmp.eq.s32.totalorder %s1237_s17, 0  ;;  %p57_p3 = scmp.ne.s32.totalorder %s1221_s13, %s1217_s12 }
   0xc   : > { %s1569_s20 = smov (%p37_p0, %s35_s20), 0  ;;  %p58_p5 = scmp.eq.s32.totalorder %s880_s18, 0 }
   0xd   : > { %p1306_p4 = por %p52_p2, %p51_p1  ;;  %s41_s23 = ssub.s32 %s1233_s16, %s1569_s20 }
   0xe   : > { %p135_p6 = scmp.eq.s32.totalorder %s880_s18, 1  ;;  %p42_p7 = scmp.eq.s32.totalorder %s41_s23, 0 }
   0xf   : > { %p1312_p8 = por %p58_p5, %p57_p3  ;;  %p141_p10 = scmp.eq.s32.totalorder %s881_s19, 1 }
  0x10   : > { %p1316_p9 = por %p135_p6, %p51_p1  ;;  %p1002_p13 = scmp.lt.s32.totalorder %s1237_s17, 2 }
  0x11   : > { %s1552_s24 = scalar_select %p1312_p8, 1, 0 }
  0x12   : > { %s1553_s25 = scalar_select %p1316_p9, 1, 0 }
  0x13   : > { %s1321_s26 = scalar_select %p42_p7, %s1225_s14, %s44_s21  }
  0x14   : > { %p1323_p11 = por %p141_p10, %p57_p3  ;;  %s1330_s28 = sand.u32 1, %s1225_s14  }
  0x15   : > { %s884_s29 = sshll.u32 %s1330_s28, 4  ;;  %s935_s30 = sshll.u32 %s1233_s16, 8 }
  0x16   : > { %s1554_s27 = scalar_select %p1323_p11, 1, 0 }
  0x17   : > { %s1337_s6 = scalar_lea.hbm %s1545_s0, %s935_s30  ;;  %s165_s7 = scalar_lea.vmem [#allocation2], %s884_s29 }
  0x18   : > { %s174_s8 = sshll.u32 %s165_s7, 4  ;;  %p1343_p0 = pnand %p1002_p13, %p1306_p4  ;;  %s1339_s8 = int_to_ptr.vmem [resolvable:$true] %s174_s8 }
  0x19   : > { %s162_s10 = scalar_lea.sflag [#allocation3], %s1330_s28  ;;  %s1091_s11 = scalar_lea.hbm %s1337_s6, 256 }
  0x1a   : > { %p1092_p3 = scmp.ne.s32.totalorder %s1337_s6, %s1091_s11  ;;  %p1093_p5 = pneg %p1343_p0 }
  0x1b   : > { %s1096_s21 = scalar_lea.hbm %s1545_s0, 512  ;;  %p1097_p4 = scmp.lt.u32.totalorder %s1337_s6, %s1545_s0 }
  0x1c   : > { %p1094_p6 = pnand %p1093_p5, %p1092_p3  ;;  %p1098_p10 = scmp.lt.u32.totalorder %s1096_s21, %s1091_s11 }
  0x1d   : > { %p1100_p12 = scmp.lt.u32.totalorder %s1091_s11, %s1337_s6 }
  0x1e   : > { %p1095_p7 = pneg %p1094_p6  ;;  %p1099_p13 = por %p1098_p10, %p1097_p4 }
  0x20   : > { %p1101_p1 = por %p1100_p12, %p1099_p13 }
  0x22   : > { %p1102_p2 = pnand %p1101_p1, %p1095_p7 }
  0x24   : > { %1105 = shalt.err (!%p1102_p2)
}
  0x25   : > { %s1106_s29 = scalar_lea.vmem %s1339_s8, 256  ;;  %s1239_s30 = smov [#allocation2]  }
  0x26   : > { %p1107_p3 = scmp.ne.s32.totalorder %s1339_s8, %s1106_s29  ;;  %s1111_s4 = sshll.u32 %s1239_s30, 4  ;;  %s1112_s4 = int_to_ptr.vmem [resolvable:$false] %s1111_s4 }
  0x27   : > { %s1113_s5 = scalar_lea.vmem %s1112_s4, 512  ;;  %p1114_p9 = scmp.lt.s32.totalorder %s1339_s8, %s1112_s4 }
  0x28   : > { %p1109_p6 = pnand %p1107_p3, %p1093_p5  ;;  %p1115_p4 = scmp.lt.s32.totalorder %s1113_s5, %s1106_s29 }
  0x2a   : > { %p1110_p11 = pneg %p1109_p6  ;;  %p1116_p10 = por %p1115_p4, %p1114_p9 }
  0x2c   : > { %p1117_p12 = pnand %p1116_p10, %p1110_p11 }
  0x2e   : > { %1120 = shalt.err (!%p1117_p12)
}
  0x2f   : > { %994 = dma.hbm_to_vmem [thread:$0]  (!%p1343_p0), %s1337_s6, 256, %s1339_s8, %s162_s10  }
  0x30   : > { %p1556_p1 = scmp.lt.s32.totalorder %s1237_s17, 3  ;;  %p1557_p2 = scmp.ge.s32.totalorder %s1237_s17, 1 }
  0x31   : > { %s887_s11 = sshll.u32 %s1330_s28, 8  ;;  %s936_s18 = sshll.u32 %s1233_s16, 12 }
  0x32   : > { %p1379_p7 = pnand %p1557_p2, %p1556_p1  ;;  %s1388_s22 = scalar_lea.hbm %s1546_s1, %s936_s18 }
  0x33   : > { %s185_s23 = scalar_lea.vmem [#allocation5], %s887_s11  ;;  %s182_s6 = scalar_lea.sflag [#allocation6], %s1330_s28 }
  0x34   : > { %s193_s29 = sshll.u32 %s185_s23, 4  ;;  %s1121_s8 = scalar_lea.hbm %s1388_s22, 4096  ;;  %s1390_s29 = int_to_ptr.vmem [resolvable:$true] %s193_s29 }
  0x35   : > { %p1122_p9 = scmp.ne.s32.totalorder %s1388_s22, %s1121_s8  ;;  %s1126_s4 = scalar_lea.hbm %s1546_s1, 8192 }
  0x36   : > { %p1127_p3 = scmp.lt.u32.totalorder %s1388_s22, %s1546_s1  ;;  %p1128_p6 = scmp.lt.u32.totalorder %s1126_s4, %s1121_s8 }
  0x37   : > { %p1124_p11 = pnand %p1122_p9, %p1093_p5  ;;  %p1130_p10 = scmp.lt.u32.totalorder %s1121_s8, %s1388_s22 }
  0x38   : > { %p1129_p4 = por %p1128_p6, %p1127_p3 }
  0x39   : > { %p1125_p13 = pneg %p1124_p11 }
  0x3a   : > { %p1131_p12 = por %p1130_p10, %p1129_p4 }
  0x3c   : > { %p1132_p1 = pnand %p1131_p12, %p1125_p13 }
  0x3e   : > { %1135 = shalt.err (!%p1132_p1)
}
  0x3f   : > { %s1136_s11 = scalar_lea.vmem %s1390_s29, 4096  ;;  %s1240_s19 = smov [#allocation5]  }
  0x40   : > { %p1137_p2 = scmp.ne.s32.totalorder %s1390_s29, %s1136_s11  ;;  %s1141_s21 = sshll.u32 %s1240_s19, 4  ;;  %s1142_s21 = int_to_ptr.vmem [resolvable:$false] %s1141_s21 }
  0x41   : > { %s1143_s23 = scalar_lea.vmem %s1142_s21, 8192  ;;  %p1144_p8 = scmp.lt.s32.totalorder %s1390_s29, %s1142_s21 }
  0x42   : > { %p1139_p9 = pnand %p1137_p2, %p1093_p5  ;;  %p1145_p3 = scmp.lt.s32.totalorder %s1143_s23, %s1136_s11 }
  0x44   : > { %p1140_p11 = pneg %p1139_p9  ;;  %p1146_p6 = por %p1145_p3, %p1144_p8 }
  0x46   : > { %p1147_p4 = pnand %p1146_p6, %p1140_p11 }
  0x48   : > { %1150 = shalt.err (!%p1147_p4)
}
  0x49   : > { %s1241_s8 = smov 64   ;;  %s1242_s10 = smov 4  }
  0x4a   : > { %997 = dma.hbm_to_vmem [thread:$0]  (!%p1343_p0), %s1388_s22, 4096, %s1390_s29, %s182_s6, %s1241_s8, %s1241_s8, %s1242_s10  }
  0x4b   : > { %205 = sbr.rel (%p1379_p7) target bundleno = 354 (0x162), region = 28  ;;  %s1421_s30 = sand.u32 (!%p1379_p7), 1, %s1221_s13  }
  0x4c   : > { %s891_s4 = sshll.u32 (!%p1379_p7), %s1421_s30, 4  ;;  %s208_s5 = scalar_lea.sflag (!%p1379_p7), [#allocation3], %s1421_s30 }
  0x4d   : > { %s1425_s18 = scalar_lea.vmem (!%p1379_p7), [#allocation2], %s891_s4  ;;  %p1559_p8 = scmp.ne.s32.totalorder (!%p1379_p7), %s1552_s24, 0 }
  0x52   : > { %1204 = dma.done.wait (%p1559_p8), %s208_s5, 256  }
  0x53   : > { %1206 = vsyncadd (%p1559_p8), %s208_s5, 4294967040  ;;  %s892_s28 = sshll.u32 %s1421_s30, 8  ;;  %s217_s9 = scalar_lea.sflag [#allocation6], %s1421_s30 }
  0x54   : > { %s1433_s7 = scalar_lea.vmem [#allocation5], %s892_s28 }
  0x55   : > { %1208 = dma.done.wait (%p1559_p8), %s217_s9, 4096  }
  0x56   : > { %1210 = vsyncadd (%p1559_p8), %s217_s9, 4294963200  ;;  %v1055_v0 = vld [vmem:[%s1433_s7 + $0x40] sm:$0xff]   ;;  %v1059_v4 = vld [vmem:[%s1433_s7 + $0x48] sm:$0xff]   ;;  %vm660_vm0 = vcmask 1041408   ;;  %p256_p0 = scmp.lt.s32.totalorder %s1229_s15, 1  ;;  %s893_s21 = sshll.u32 %s1421_s30, 3 }
  0x57   : > { %v1056_v1 = vld [vmem:[%s1433_s7 + $0xc0] sm:$0xff]   ;;  %937 = vmatprep.subr.bf16.mxu0 %v1055_v0  ;;  %v1060_v5 = vld [vmem:[%s1433_s7 + $0xc8] sm:$0xff]   ;;  %v1063_v8 = vld [vmem:[%s1433_s7 + $0x50] sm:$0xff]   ;;  %s932_s8 = sshll.u32 %s1229_s15, 7  ;;  %s251_s10 = scalar_lea.vmem [#allocation7], %s893_s21 }
  0x58   : > { %v1057_v2 = vld [vmem:[%s1433_s7] sm:$0xff]   ;;  %959 = vmatprep.subr.bf16.mxu1 %v1056_v1  ;;  %v1061_v6 = vld [vmem:[%s1433_s7 + $0x8] sm:$0xff]   ;;  %v1064_v9 = vld [vmem:[%s1433_s7 + $0xd0] sm:$0xff]   ;;  %s257_s24 = scalar_select %p256_p0, %s1229_s15, 1 }
  0x59   : > { %v1058_v3 = vld [vmem:[%s1433_s7 + $0x80] sm:$0xff]   ;;  %938 = vmatpush3.bf16.msra.mxu0 %v1057_v2  ;;  %v1062_v7 = vld [vmem:[%s1433_s7 + $0x88] sm:$0xff]   ;;  %v1065_v10 = vld [vmem:[%s1433_s7 + $0x10] sm:$0xff]   ;;  %s753_s4 = sshll.u32 %s251_s10, 4  ;;  %s1496_s28 = scalar_lea.hbm %s1548_s3, %s932_s8  ;;  %s1498_s4 = int_to_ptr.vmem [resolvable:$true] %s753_s4 }
  0x5a   : > { %960 = vmatpush3.bf16.msra.mxu1 %v1058_v3  ;;  %939 = vmatprep.subr.bf16.mxu0 %v1059_v4  ;;  %v1066_v11 = vld [vmem:[%s1433_s7 + $0x90] sm:$0xff]   ;;  %v1067_v12 = vld [vmem:[%s1433_s7 + $0x58] sm:$0xff]   ;;  %v1071_v16 = vld [vmem:[%s1433_s7 + $0x60] sm:$0xff]   ;;  %s894_s22 = sshll.u32 %s257_s24, 3  ;;  %s737_s9 = scalar_lea.sflag [#allocation4], %s1421_s30 }
  0x5b   : > { %961 = vmatprep.subr.bf16.mxu1 %v1060_v5  ;;  %v1068_v13 = vld [vmem:[%s1433_s7 + $0xd8] sm:$0xff]   ;;  %v1072_v17 = vld [vmem:[%s1433_s7 + $0xe0] sm:$0xff]   ;;  %v1075_v20 = vld [vmem:[%s1433_s7 + $0x68] sm:$0xff]   ;;  %s1486_s11 = scalar_lea.vmem %s1547_s2, %s894_s22  ;;  %p1560_p7 = scmp.ne.s32.totalorder %s1553_s25, 0 }
  0x5c   : > { %v1069_v14 = vld [vmem:[%s1433_s7 + $0x18] sm:$0xff]   ;;  %v1073_v18 = vld [vmem:[%s1433_s7 + $0x20] sm:$0xff]   ;;  %v1076_v21 = vld [vmem:[%s1433_s7 + $0xe8] sm:$0xff]   ;;  %s1244_s15 = smov [#allocation7]  }
  0x5d   : > { %940 = vmatpush3.bf16.msra.mxu0 %v1061_v6  ;;  %v1070_v15 = vld [vmem:[%s1433_s7 + $0x98] sm:$0xff]   ;;  %v1074_v19 = vld [vmem:[%s1433_s7 + $0xa0] sm:$0xff]   ;;  %v1077_v22 = vld [vmem:[%s1433_s7 + $0x28] sm:$0xff]   ;;  %s1155_s24 = sshll.u32 %s1244_s15, 4  ;;  %s1156_s24 = int_to_ptr.vmem [resolvable:$false] %s1155_s24 }
  0x5e   : > { %962 = vmatpush3.bf16.msra.mxu1 %v1062_v7  ;;  %941 = vmatprep.subr.bf16.mxu0 %v1063_v8  ;;  %v1078_v23 = vld [vmem:[%s1433_s7 + $0xa8] sm:$0xff]   ;;  %v1079_v24 = vld [vmem:[%s1433_s7 + $0x70] sm:$0xff]   ;;  %v1083_v34 = vld [vmem:[%s1433_s7 + $0x78] sm:$0xff]   ;;  %s1157_s22 = scalar_lea.vmem %s1156_s24, 256  ;;  %p1158_p12 = scmp.lt.s32.totalorder %s1498_s4, %s1156_s24 }
  0x5f   : > { %963 = vmatprep.subr.bf16.mxu1 %v1064_v9  ;;  %v1080_v25 = vld [vmem:[%s1433_s7 + $0xf0] sm:$0xff]   ;;  %v268_v29 = vld [vmem:[%s1425_s18 + $0x8] sm:$0x77] }
  0x60   : > { %v1081_v26 = vld [vmem:[%s1433_s7 + $0x30] sm:$0xff]   ;;  %v624_v32 = vunpack.c.l.bf16 %v268_v29  ;;  %v625_v33 = vunpack.c.h.bf16 %v268_v29  ;;  %v1084_v35 = vld [vmem:[%s1433_s7 + $0xf8] sm:$0xff]   ;;  %v898_v37 = vcombine.high %v268_v29, %v268_v29  ;;  %v897_v45 = vcombine.low %v268_v29, %v268_v29 }
  0x61   : > { %942 = vmatpush3.bf16.msra.mxu0 %v1065_v10  ;;  %v1082_v27 = vld [vmem:[%s1433_s7 + $0xb0] sm:$0xff]   ;;  %v1085_v42 = vld [vmem:[%s1433_s7 + $0x38] sm:$0xff]  }
  0x62   : > { %964 = vmatpush3.bf16.msra.mxu1 %v1066_v11  ;;  %943 = vmatprep.subr.bf16.mxu0 %v1067_v12  ;;  %v267_v28 = vld [vmem:[%s1425_s18] sm:$0x77]  ;;  %v634_v40 = vrot.slane %v624_v32, 6  ;;  %v635_v41 = vrot.slane %v625_v33, 6  ;;  %v1086_v50 = vld [vmem:[%s1433_s7 + $0xb8] sm:$0xff]   ;;  %v683_v52 = vrot.slane %v624_v32, 4 }
  0x63   : > { %965 = vmatprep.subr.bf16.mxu1 %v1068_v13  ;;  %v622_v30 = vunpack.c.l.bf16 %v267_v28  ;;  %v623_v31 = vunpack.c.h.bf16 %v267_v28  ;;  %v896_v36 = vcombine.high %v267_v28, %v267_v28  ;;  %v895_v44 = vcombine.low %v267_v28, %v267_v28  ;;  %612 = vmatprep.mubr.bf16.mxu1 %v898_v37  ;;  %s1151_s7 = scalar_lea.vmem %s1498_s4, 128 }
  0x64   : > { %v642_v48 = vsub.f32 %v624_v32, %v634_v40  ;;  %v643_v49 = vsub.f32 %v625_v33, %v635_v41  ;;  %v684_v53 = vrot.slane %v625_v33, 4  ;;  %v691_v60 = vsub.f32 %v624_v32, %v683_v52  ;;  %p1152_p5 = scmp.ne.s32.totalorder %s1498_s4, %s1151_s7  ;;  %p1159_p1 = scmp.lt.s32.totalorder %s1157_s22, %s1151_s7 }
  0x65   : > { %944 = vmatpush3.bf16.msra.mxu0 %v1069_v14  ;;  %v632_v38 = vrot.slane %v622_v30, 6  ;;  %v633_v39 = vrot.slane %v623_v31, 6  ;;  %v681_v43 = vrot.slane %v622_v30, 4  ;;  %572 = vmatprep.mubr.bf16.mxu0 %v896_v36  ;;  %v682_v51 = vrot.slane %v623_v31, 4 }
  0x66   : > { %966 = vmatpush3.bf16.msra.mxu1 %v1070_v15  ;;  %945 = vmatprep.subr.bf16.mxu0 %v1071_v16  ;;  %v646_v57 = vand.u32 2147483647, %v642_v48  ;;  %v647_v58 = vand.u32 2147483647, %v643_v49  ;;  %v692_v61 = vsub.f32 %v625_v33, %v684_v53  ;;  %v695_v4 = vand.u32 2147483647, %v691_v60  ;;  %p1153_p13 = pnand %p1152_p5, %p1560_p7  ;;  %p1160_p2 = por %p1159_p1, %p1158_p12 }
  0x67   : > { %967 = vmatprep.subr.bf16.mxu1 %v1072_v17  ;;  %v640_v46 = vsub.f32 %v622_v30, %v632_v38  ;;  %v641_v47 = vsub.f32 %v623_v31, %v633_v39  ;;  %v689_v54 = vsub.f32 %v622_v30, %v681_v43  ;;  %v690_v59 = vsub.f32 %v623_v31, %v682_v51 }
  0x68   : > { %v654_v0 = vrot.slane %v646_v57, 2  ;;  %v655_v2 = vrot.slane %v647_v58, 2  ;;  %v696_v8 = vand.u32 2147483647, %v692_v61  ;;  %v703_v13 = vrot.slane %v695_v4, 4  ;;  %p1154_p10 = pneg %p1153_p13 }
  0x69   : > { %946 = vmatpush3.bf16.msra.mxu0 %v1073_v18  ;;  %v644_v55 = vand.u32 2147483647, %v640_v46  ;;  %v645_v56 = vand.u32 2147483647, %v641_v47  ;;  %v693_v1 = vand.u32 2147483647, %v689_v54  ;;  %v626_v39 = vlaneseq }
  0x6a   : > { %968 = vmatpush3.bf16.msra.mxu1 %v1074_v19  ;;  %947 = vmatprep.subr.bf16.mxu0 %v1075_v20  ;;  %v694_v3 = vand.u32 2147483647, %v690_v59  ;;  %v664_v7 = vsel %vm660_vm0, %v654_v0, 0.0  ;;  %v666_v12 = vsel %vm660_vm0, %v655_v2, 0.0  ;;  %v704_v14 = vrot.slane %v696_v8, 4  ;;  %p1161_p9 = pnand %p1160_p2, %p1154_p10 }
  0x6b   : > { %969 = vmatprep.subr.bf16.mxu1 %v1076_v21  ;;  %v652_v62 = vrot.slane %v644_v55, 2  ;;  %v653_v63 = vrot.slane %v645_v56, 2  ;;  %v701_v10 = vrot.slane %v693_v1, 4  ;;  %v712_v19 = vsel %vm660_vm0, %v703_v13, 0.0 }
  0x6c   : > { %v702_v11 = vrot.slane %v694_v3, 4  ;;  %v714_v21 = vsel %vm660_vm0, %v704_v14, 0.0  ;;  %v627_v40 = vshrl.u32 %v626_v39, 7 }
  0x6d   : > { %948 = vmatpush3.bf16.msra.mxu0 %v1077_v22  ;;  %v661_v5 = vsel %vm660_vm0, %v652_v62, 0.0  ;;  %v662_v6 = vsel %vm660_vm0, %v653_v63, 0.0  ;;  %v709_v16 = vsel %vm660_vm0, %v701_v10, 0.0 }
  0x6e   : > { %970 = vmatpush3.bf16.msra.mxu1 %v1078_v23  ;;  %949 = vmatprep.subr.bf16.mxu0 %v1079_v24  ;;  %v663_v9 = vadd.f32 %v662_v6, %v661_v5  ;;  %v710_v17 = vsel %vm660_vm0, %v702_v11, 0.0  ;;  %v1243_v24 = vmov 0.0   ;;  %vm677_vm1 = vcmp.eq.s32.totalorder %v627_v40, 0 }
  0x6f   : > { %971 = vmatprep.subr.bf16.mxu1 %v1080_v25  ;;  %v711_v18 = vadd.f32 %v710_v17, %v709_v16  ;;  %265 = vst [vmem:[%s1486_s11] sm:$0x3f] %v1243_v24  ;;  %vm725_vm2 = vcmp.eq.s32.totalorder %v627_v40, 1 }
  0x70   : > { %v665_v15 = vadd.f32 %v664_v7, %v663_v9 }
  0x71   : > { %950 = vmatpush3.bf16.msra.mxu0 %v1081_v26  ;;  %v713_v22 = vadd.f32 %v712_v19, %v711_v18 }
  0x72   : > { %972 = vmatpush3.bf16.msra.mxu1 %v1082_v27  ;;  %951 = vmatprep.subr.bf16.mxu0 %v1083_v34  ;;  %v667_v20 = vadd.f32 %v666_v12, %v665_v15 }
  0x73   : > { %973 = vmatprep.subr.bf16.mxu1 %v1084_v35  ;;  %v715_v23 = vadd.f32 %v714_v21, %v713_v22 }
  0x74   : > { %668 = vadd.xlane.f32.xlu0 %v667_v20 }
  0x75   : > { %952 = vmatpush3.bf16.msra.mxu0 %v1085_v42 }
  0x76   : > { %974 = vmatpush3.bf16.msra.mxu1 %v1086_v50  ;;  %v269_v51 = vld [vmem:[%s1486_s11] sm:$0x3f] }
  0x78   : > { %573 = vmatmul.mubr.bf16.vlgmr.msra.gmra.mrb[0].mxu0 %v895_v44  ;;  %716 = vadd.xlane.f32.xlu0 %v715_v23 }
  0x79   : > { %613 = vmatmul.mubr.bf16.vlgmr.msra.gmra.mrb[0].mxu1 %v897_v45 }
 0x101   : > { %v669_v25 = vpop.xlane.xlu0 %668 }
 0x102   : > { %v670_v26 = vrot.slane %v669_v25, 4 }
 0x104   : > { %v671_v27 = vadd.f32 %v670_v26, %v669_v25 }
 0x105   : > { %v717_v28 = vpop.xlane.xlu0 %716 }
 0x106   : > { %v672_v29 = vrot.slane %v671_v27, 2  ;;  %v718_v30 = vrot.slane %v717_v28, 4 }
 0x108   : > { %v719_v31 = vadd.f32 %v718_v30, %v717_v28  ;;  %v673_v32 = vadd.f32 %v672_v29, %v671_v27 }
 0x10a   : > { %v720_v33 = vrot.slane %v719_v31, 2  ;;  %v674_v34 = vrot.slane %v673_v32, 1 }
 0x10c   : > { %v721_v35 = vadd.f32 %v720_v33, %v719_v31  ;;  %v675_v36 = vadd.f32 %v674_v34, %v673_v32 }
 0x10e   : > { %981 = vpush %v675_v36  ;;  %v722_v37 = vrot.slane %v721_v35, 1 }
 0x110   : > { %v723_v38 = vadd.f32 %v722_v37, %v721_v35 }
 0x112   : > { %983 = vpush %v723_v38 }
 0x13f   : > { %s982_s19 = spop %981 }
 0x140   : > { %v678_v44 = vstv %s982_s19 }
 0x141   : > { %v679_v53 = vsel %vm677_vm1, %v678_v44, 0.0 }
 0x143   : > { %s984_s23 = spop %983 }
 0x144   : > { %v726_v55 = vstv %s984_s23 }
 0x145   : > { %v727_v56 = vsel %vm725_vm2, %v726_v55, 0.0 }
 0x146   : > { %v728_v58 = vadd.f32 %v727_v56, %v679_v53 }
 0x148   : > { %731 = vst [vmem:[%s251_s10] sm:$0xff] %v728_v58 }
 0x14b   : > { %v953_v41 = vpop.f32.mrb[0].mxu0 }
 0x14c   : > { %v975_v42 = vpop.f32.mrb[0].mxu1  ;;  %v954_v43 = vpop.f32.mrb[1].mxu0 }
 0x14d   : > { %v955_v45 = vadd.f32 %v954_v43, %v953_v41  ;;  %v976_v46 = vpop.f32.mrb[1].mxu1  ;;  %v956_v47 = vpop.f32.mrb[2].mxu0 }
 0x14e   : > { %v977_v48 = vadd.f32 %v976_v46, %v975_v42  ;;  %v978_v49 = vpop.f32.mrb[2].mxu1  ;;  %v957_v50 = vpop.f32.mrb[3].mxu0 }
 0x14f   : > { %v979_v52 = vpop.f32.mrb[3].mxu1 }
 0x150   : > { %v615_v54 = vadd.f32 %v977_v48, %v955_v45 }
 0x152   : > { %v620_v57 = vadd.f32 %v615_v54, %v269_v51 }
 0x154   : > { %621 = vst [vmem:[%s1486_s11] sm:$0x3f] %v620_v57 }
 0x155   : > { %1164 = shalt.err (!%p1161_p9)
}
 0x156   : > { %s1165_s30 = scalar_lea.hbm %s1496_s28, 128  ;;  %s1169_s11 = scalar_lea.hbm %s1548_s3, 256 }
 0x157   : > { %p1166_p11 = scmp.ne.s32.totalorder %s1496_s28, %s1165_s30  ;;  %p1170_p4 = scmp.lt.u32.totalorder %s1496_s28, %s1548_s3 }
 0x158   : > { %p1171_p8 = scmp.lt.u32.totalorder %s1169_s11, %s1165_s30  ;;  %p1173_p5 = scmp.lt.u32.totalorder %s1165_s30, %s1496_s28 }
 0x159   : > { %p1167_p3 = pnand %p1166_p11, %p1560_p7 }
 0x15a   : > { %p1172_p0 = por %p1171_p8, %p1170_p4 }
 0x15b   : > { %p1168_p6 = pneg %p1167_p3 }
 0x15c   : > { %p1174_p13 = por %p1173_p5, %p1172_p0 }
 0x15e   : > { %p1175_p10 = pnand %p1174_p13, %p1168_p6 }
 0x160   : > { %1178 = shalt.err (!%p1175_p10)
}
 0x161   : > { %989 = dma.vmem_to_hbm [thread:$0]  (%p1560_p7), %s1498_s4, 128, %s1496_s28, %s737_s9  }
 0x162 PF: > { %s772_s23 = sand.u32 1, %s1217_s12   ;;  %p1561_p12 = scmp.ne.s32.totalorder %s1554_s27, 0 }
 0x163   : > { %p1562_p1 = scmp.ge.s32.totalorder %s1237_s17, 2  ;;  %s773_s8 = scalar_lea.sflag [#allocation4], %s772_s23 }
 0x165   : > { %p999_p2 = pnand %p1562_p1, %p1561_p12 }
 0x167   : > { %1212 = dma.done.wait (!%p999_p2), %s773_s8, 128  }
 0x168   : > { %1214 = vsyncadd (!%p999_p2), %s773_s8, 4294967168  ;;  %s23_s17 = sadd.s32 1, %s1237_s17   ;;  %s1563_s12 = smov %s1221_s13 }
 0x169   : > { %p20_p9 = scmp.ge.s32.totalorder %s23_s17, 4   ;;  %s1564_s13 = smov %s1225_s14 }
 0x16a   : > { %s1565_s14 = smov %s1321_s26  ;;  %s1566_s15 = smov %s1233_s16 }
 0x16b   : > { %s1567_s16 = smov %s1569_s20  ;;  %22 = sbr.rel (!%p20_p9) target bundleno = 8 (0x8), region = 102 }
 0x172   :  { %778 = vsyncpa [#allocation3], 1 }
 0x173   :  { %780 = vsyncpa [#allocation3 + $0x1], 1 }
 0x174   :  { %781 = vsyncpa [#allocation6], 1 }
 0x175   :  { %783 = vsyncpa [#allocation6 + $0x1], 1 }
 0x176   :  { %784 = vsyncpa [#allocation4], 1 }
 0x177   :  { %786 = vsyncpa [#allocation4 + $0x1], 1 }

</bundles_post_ra>
